<compile_context>
chip_gen: v5e
topology: v5e:2x2
jax: 0.10.0
libtpu: 0.0.40
codegen_flags: <defaults>
</compile_context>

<pallas_src>
import jax
import jax.numpy as jnp
from jax.experimental import pallas as pl
from jax.experimental.pallas import tpu as pltpu

N_EMBD = 32
DROPOUT_P = 0.2


def ffn_kernel(x_ref, w1_ref, b1_ref, w2_ref, b2_ref, drop_ref, o_ref):
    # Linear 1: bf16 MXU operands, f32 accumulate, bias + ReLU on the VPU.
    h = jnp.dot(x_ref[...], w1_ref[...], preferred_element_type=jnp.float32)
    h = jnp.maximum(h + b1_ref[...], 0.0)

    # Linear 2.
    y = jnp.dot(h.astype(jnp.bfloat16), w2_ref[...],
                preferred_element_type=jnp.float32)
    y = y + b2_ref[...]

    # Dropout: drop_ref already holds keep_mask / (1 - p) (ones in eval mode).
    y = y * drop_ref[...]

    o_ref[...] = y.astype(o_ref.dtype)


def feed_forward(x, w1, b1, w2, b2, key, *, dropout_p=DROPOUT_P, training=True):
    """x: (B, T, C) float32. w1/w2 are (in, out) = pre-transposed nn.Linear weights."""
    B, T, C = x.shape
    M = B * T
    x2 = x.reshape(M, C)

    # Token-dim tile: whole slab if small, otherwise MXU-friendly 512-row tiles
    # (multiple of 256 for v6e/v7x, multiple of 128 for v5e; tiny VMEM footprint
    # at C=32 so no explicit vmem_limit_bytes needed).
    TM = M if M <= 512 else 512
    M_pad = pl.cdiv(M, TM) * TM
    if M_pad != M:
        x2 = jnp.pad(x2, ((0, M_pad - M), (0, 0)))

    # Dropout scale (training semantics of nn.Dropout: drop w.p. p, scale by 1/(1-p)).
    if training and dropout_p > 0.0:
        keep = jax.random.bernoulli(key, 1.0 - dropout_p, (M_pad, C))
        drop_scale = keep.astype(jnp.float32) / (1.0 - dropout_p)
    else:
        drop_scale = jnp.ones((M_pad, C), jnp.float32)

    # Cast once in the wrapper: bf16 operands halve HBM->VMEM bytes and double
    # MXU throughput; accumulation stays f32 inside the kernel.
    x_bf = x2.astype(jnp.bfloat16)
    w1_bf = w1.astype(jnp.bfloat16)
    w2_bf = w2.astype(jnp.bfloat16)
    b1_2 = b1.reshape(1, C).astype(jnp.float32)
    b2_2 = b2.reshape(1, C).astype(jnp.float32)

    grid = (M_pad // TM,)
    flops = 4 * M_pad * C * C  # two (TM,C)x(C,C) matmuls per tile
    bytes_accessed = (x_bf.size * 2 + drop_scale.size * 4 + M_pad * C * 4
                      + w1_bf.size * 2 + w2_bf.size * 2
                      + (b1_2.size + b2_2.size) * 4)

    out = pl.pallas_call(
        ffn_kernel,
        out_shape=jax.ShapeDtypeStruct((M_pad, C), x.dtype),
        grid_spec=pltpu.PrefetchScalarGridSpec(
            num_scalar_prefetch=0,
            grid=grid,
            in_specs=[
                pl.BlockSpec((TM, C), lambda i: (i, 0)),  # x tile (pipelined)
                pl.BlockSpec((C, C), lambda i: (0, 0)),   # w1, resident in VMEM
                pl.BlockSpec((1, C), lambda i: (0, 0)),   # b1, resident
                pl.BlockSpec((C, C), lambda i: (0, 0)),   # w2, resident
                pl.BlockSpec((1, C), lambda i: (0, 0)),   # b2, resident
                pl.BlockSpec((TM, C), lambda i: (i, 0)),  # dropout scale tile
            ],
            out_specs=pl.BlockSpec((TM, C), lambda i: (i, 0)),
        ),
        compiler_params=pltpu.CompilerParams(
            # M-axis grid steps are independent -> shardable across v7x's 2 TCs.
            dimension_semantics=("parallel",)),
        cost_estimate=pl.CostEstimate(
            flops=flops, transcendentals=0, bytes_accessed=bytes_accessed),
    )(x_bf, w1_bf, b1_2, w2_bf, b2_2, drop_scale)

    return out[:M].reshape(B, T, C)


if __name__ == "__main__":
    key = jax.random.PRNGKey(0)
    kx, k1, k2, k3, k4, kd = jax.random.split(key, 6)

    B, T, C = 2, 8, N_EMBD
    x = jax.random.normal(kx, (B, T, C), dtype=jnp.float32)

    # PyTorch nn.Linear(C, C): weight (out, in), bias (out,), U(-1/sqrt(C), 1/sqrt(C)).
    bound = 1.0 / (C ** 0.5)
    w1_t = jax.random.uniform(k1, (C, C), minval=-bound, maxval=bound, dtype=jnp.float32)
    b1 = jax.random.uniform(k2, (C,), minval=-bound, maxval=bound, dtype=jnp.float32)
    w2_t = jax.random.uniform(k3, (C, C), minval=-bound, maxval=bound, dtype=jnp.float32)
    b2 = jax.random.uniform(k4, (C,), minval=-bound, maxval=bound, dtype=jnp.float32)

    # Pre-transpose to (in, out) so the kernel computes x @ W + b == x @ W_pt.T + b.
    w1 = w1_t.T
    w2 = w2_t.T

    out = feed_forward(x, w1, b1, w2, b2, kd)
    jax.block_until_ready(out)
    assert out.shape == (B, T, C)
    assert bool(jnp.all(jnp.isfinite(out)))
    print("KERNEL_OK")
</pallas_src>

<mosaic_0001>
module attributes {stable_mosaic.version = 11 : i64} {
  func.func @ffn_kernel(%arg0: i32, %arg1: memref<16x32xbf16, #tpu.memory_space<vmem>>, %arg2: memref<32x32xbf16, #tpu.memory_space<vmem>>, %arg3: memref<1x32xf32, #tpu.memory_space<vmem>>, %arg4: memref<32x32xbf16, #tpu.memory_space<vmem>>, %arg5: memref<1x32xf32, #tpu.memory_space<vmem>>, %arg6: memref<16x32xf32, #tpu.memory_space<vmem>>, %arg7: memref<16x32xf32, #tpu.memory_space<vmem>>) attributes {dimension_semantics = [#tpu.dimension_semantics<parallel>], iteration_bounds = array<i64: 1>, scalar_prefetch = 0 : i64, scratch_operands = 0 : i64, tpu.core_type = #tpu.core_type<tc>, window_params = [{transform_indices = @transform_0, window_bounds = array<i64: 16, 32>}, {pipeline_mode = #tpu.pipeline_mode<synchronous>, transform_indices = @transform_1, window_bounds = array<i64: 32, 32>}, {pipeline_mode = #tpu.pipeline_mode<synchronous>, transform_indices = @transform_2, window_bounds = array<i64: 1, 32>}, {pipeline_mode = #tpu.pipeline_mode<synchronous>, transform_indices = @transform_3, window_bounds = array<i64: 32, 32>}, {pipeline_mode = #tpu.pipeline_mode<synchronous>, transform_indices = @transform_4, window_bounds = array<i64: 1, 32>}, {transform_indices = @transform_5, window_bounds = array<i64: 16, 32>}, {transform_indices = @transform_6, window_bounds = array<i64: 16, 32>}]} {
    %c0 = arith.constant 0 : index
    %c0_0 = arith.constant 0 : index
    %0 = vector.load %arg1[%c0, %c0_0] : memref<16x32xbf16, #tpu.memory_space<vmem>>, vector<16x32xbf16>
    %c0_1 = arith.constant 0 : index
    %c0_2 = arith.constant 0 : index
    %1 = vector.load %arg2[%c0_1, %c0_2] : memref<32x32xbf16, #tpu.memory_space<vmem>>, vector<32x32xbf16>
    %cst = arith.constant dense<0.000000e+00> : vector<16x32xf32>
    %2 = tpu.matmul %0, %1, %cst {dimension_numbers = #tpu.dot_dimension_numbers<[1], [0], [0], [1], [0, 0, 1, 1], [], []>} : vector<16x32xbf16>, vector<32x32xbf16>, vector<16x32xf32> -> vector<16x32xf32>
    %c0_3 = arith.constant 0 : index
    %c0_4 = arith.constant 0 : index
    %3 = vector.load %arg3[%c0_3, %c0_4] : memref<1x32xf32, #tpu.memory_space<vmem>>, vector<1x32xf32>
    %4 = vector.broadcast %3 : vector<1x32xf32> to vector<16x32xf32>
    %5 = arith.addf %2, %4 : vector<16x32xf32>
    %cst_5 = arith.constant 0.000000e+00 : f32
    %6 = vector.broadcast %cst_5 : f32 to vector<16x32xf32>
    %7 = arith.maximumf %5, %6 : vector<16x32xf32>
    %8 = arith.truncf %7 : vector<16x32xf32> to vector<16x32xbf16>
    %c0_6 = arith.constant 0 : index
    %c0_7 = arith.constant 0 : index
    %9 = vector.load %arg4[%c0_6, %c0_7] : memref<32x32xbf16, #tpu.memory_space<vmem>>, vector<32x32xbf16>
    %cst_8 = arith.constant dense<0.000000e+00> : vector<16x32xf32>
    %10 = tpu.matmul %8, %9, %cst_8 {dimension_numbers = #tpu.dot_dimension_numbers<[1], [0], [0], [1], [0, 0, 1, 1], [], []>} : vector<16x32xbf16>, vector<32x32xbf16>, vector<16x32xf32> -> vector<16x32xf32>
    %c0_9 = arith.constant 0 : index
    %c0_10 = arith.constant 0 : index
    %11 = vector.load %arg5[%c0_9, %c0_10] : memref<1x32xf32, #tpu.memory_space<vmem>>, vector<1x32xf32>
    %12 = vector.broadcast %11 : vector<1x32xf32> to vector<16x32xf32>
    %13 = arith.addf %10, %12 : vector<16x32xf32>
    %c0_11 = arith.constant 0 : index
    %c0_12 = arith.constant 0 : index
    %14 = vector.load %arg6[%c0_11, %c0_12] : memref<16x32xf32, #tpu.memory_space<vmem>>, vector<16x32xf32>
    %15 = arith.mulf %13, %14 : vector<16x32xf32>
    %c0_13 = arith.constant 0 : index
    %c0_14 = arith.constant 0 : index
    %16 = vector.load %arg7[%c0_13, %c0_14] : memref<16x32xf32, #tpu.memory_space<vmem>>, vector<16x32xf32>
    tpu.vector_store %arg7[%c0_13, %c0_14], %15 {strides = array<i32>} : memref<16x32xf32, #tpu.memory_space<vmem>>, vector<16x32xf32>,
    return
  }
  func.func @transform_0(%arg0: i32) -> (i32, i32) {
    %c0_i32 = arith.constant 0 : i32
    %c0_i32_0 = arith.constant 0 : i32
    return %arg0, %c0_i32 : i32, i32
  }
  func.func @transform_1(%arg0: i32) -> (i32, i32) {
    %c0_i32 = arith.constant 0 : i32
    %c0_i32_0 = arith.constant 0 : i32
    %c0_i32_1 = arith.constant 0 : i32
    return %c0_i32, %c0_i32_0 : i32, i32
  }
  func.func @transform_2(%arg0: i32) -> (i32, i32) {
    %c0_i32 = arith.constant 0 : i32
    %c0_i32_0 = arith.constant 0 : i32
    %c0_i32_1 = arith.constant 0 : i32
    return %c0_i32, %c0_i32_0 : i32, i32
  }
  func.func @transform_3(%arg0: i32) -> (i32, i32) {
    %c0_i32 = arith.constant 0 : i32
    %c0_i32_0 = arith.constant 0 : i32
    %c0_i32_1 = arith.constant 0 : i32
    return %c0_i32, %c0_i32_0 : i32, i32
  }
  func.func @transform_4(%arg0: i32) -> (i32, i32) {
    %c0_i32 = arith.constant 0 : i32
    %c0_i32_0 = arith.constant 0 : i32
    %c0_i32_1 = arith.constant 0 : i32
    return %c0_i32, %c0_i32_0 : i32, i32
  }
  func.func @transform_5(%arg0: i32) -> (i32, i32) {
    %c0_i32 = arith.constant 0 : i32
    %c0_i32_0 = arith.constant 0 : i32
    return %arg0, %c0_i32 : i32, i32
  }
  func.func @transform_6(%arg0: i32) -> (i32, i32) {
    %c0_i32 = arith.constant 0 : i32
    %c0_i32_0 = arith.constant 0 : i32
    return %arg0, %c0_i32 : i32, i32
  }
}

</mosaic_0001>

<bundles_post_ra>
// kernel: tpu_custom_call.1
= control target key start
LH: loop header
LB: loop body
LE: loop exit
PB: predicated region body
PF: predicated region fallthrough
CT: control target
= control target key end

     0   :  { %11 = vsyncpa [#allocation3], 0  ;;  %s441_s0 = inlined_call_operand.hbm [shape: bf16[16,32], index: 0, kind: input, shape index: {}]   ;;  %s442_s1 = inlined_call_operand.hbm [shape: bf16[32,32], index: 1, kind: input, shape index: {}]   ;;  %s443_s2 = inlined_call_operand.vmem [shape: f32[1,32], index: 2, kind: input, shape index: {}]   ;;  %s444_s3 = inlined_call_operand.hbm [shape: bf16[32,32], index: 3, kind: input, shape index: {}]   ;;  %s445_s4 = inlined_call_operand.vmem [shape: f32[1,32], index: 4, kind: input, shape index: {}]   ;;  %s446_s5 = inlined_call_operand.hbm [shape: f32[16,32], index: 5, kind: input, shape index: {}]   ;;  %s447_s6 = inlined_call_operand.hbm [shape: f32[16,32], index: 6, kind: output, shape index: {}]  }
   0x1   :  { %12 = vsyncpa [#allocation6], 0 }
   0x2   :  { %13 = vsyncpa [#allocation9], 0 }
   0x3   :  { %14 = vsyncpa [#allocation4], 0  ;;  %s32_s23 = sshll.u32 %s442_s1, 4  ;;  %s366_s24 = smov [#allocation5]   ;;  %s33_s23 = int_to_ptr.hbm [resolvable:$true] %s32_s23 }
   0x4   :  { %s34_s25 = sshll.u32 %s366_s24, 4  ;;  %s19_s28 = sshll.u32 %s441_s0, 4  ;;  %s35_s25 = int_to_ptr.vmem [resolvable:$true] %s34_s25  ;;  %s20_s28 = int_to_ptr.hbm [resolvable:$true] %s19_s28 }
   0x5   :  { %s367_s29 = smov 64   ;;  %s368_s30 = smov 4  }
   0x6   :  { %40 = dma.hbm_to_vmem [thread:$0]  %s33_s23, 256, %s35_s25, [#allocation6], %s367_s29, %s367_s29, %s368_s30  }
   0x7   :  { %s369_s7 = smov [#allocation2]   ;;  %s47_s11 = sshll.u32 %s444_s3, 4  ;;  %s48_s11 = int_to_ptr.hbm [resolvable:$true] %s47_s11 }
   0x8   :  { %s21_s8 = sshll.u32 %s369_s7, 4  ;;  %s62_s13 = sshll.u32 %s446_s5, 4  ;;  %s22_s8 = int_to_ptr.vmem [resolvable:$true] %s21_s8  ;;  %s63_s13 = int_to_ptr.hbm [resolvable:$true] %s62_s13 }
   0x9   :  { %27 = dma.hbm_to_vmem [thread:$0]  %s20_s28, 128, %s22_s8, [#allocation3], %s367_s29, %s367_s29, %s368_s30  }
   0xa   :  { %s370_s14 = smov [#allocation7]   ;;  %s371_s0 = smov [#allocation8]  }
   0xb   :  { %s49_s15 = sshll.u32 %s370_s14, 4  ;;  %s64_s16 = sshll.u32 %s371_s0, 4  ;;  %s50_s15 = int_to_ptr.vmem [resolvable:$true] %s49_s15  ;;  %s65_s16 = int_to_ptr.vmem [resolvable:$true] %s64_s16 }
   0xc   :  { %55 = dma.hbm_to_vmem [thread:$0]  %s48_s11, 256, %s50_s15, [#allocation6], %s367_s29, %s367_s29, %s368_s30  }
   0xd   :  { %s372_s17 = smov 128   ;;  %s373_s18 = smov 8  }
   0xe   :  { %70 = dma.hbm_to_vmem [thread:$0]  %s63_s13, 256, %s65_s16, [#allocation9], %s372_s17, %s372_s17, %s373_s18  }
   0xf   :  { %358 = dma.done.wait [#allocation3], 128  }
  0x10   :  { %359 = vsyncadd [#allocation3], 4294967168 }
  0x11   :  { %360 = dma.done.wait [#allocation6], 512  }
  0x12   :  { %361 = vsyncadd [#allocation6], 4294966784 }
  0x13   :  { %362 = dma.done.wait [#allocation9], 256  }
  0x14   :  { %363 = vsyncadd [#allocation9], 4294967040  ;;  %v224_v0 = vld [vmem:[#allocation5 + $0x8] sm:$0xff]  ;;  %v223_v1 = vld [vmem:[#allocation5] sm:$0xff]  ;;  %vm115_vm0 = vcmask 261120   ;;  %s185_s24 = sshll.u32 %s447_s6, 4  ;;  %s186_s24 = int_to_ptr.hbm [resolvable:$true] %s185_s24 }
  0x15   :  { %125 = vmatpush.bf16.msra.mxu0 %v224_v0  ;;  %v222_v2 = vld [vmem:[#allocation2] sm:$0xff]  ;;  %v225_v4 = vld [vmem:[#allocation7] sm:$0xff]  ;;  %v173_v15 = vld [vmem:[#allocation8] sm:$0xff] }
  0x16   :  { %v226_v3 = vld [vmem:[#allocation7 + $0x8] sm:$0xff]  ;;  %v174_v19 = vld [vmem:[#allocation8 + $0x8] sm:$0xff] }
  0x17   :  { %165 = vmatpush.bf16.msra.mxu1 %v226_v3  ;;  %v236_v6 = vld [vmem:[%s443_s2] ss:$0 sm:$0xff]  ;;  %s374_s2 = smov [#allocation10]  }
  0x18   :  { %v237_v13 = vld [vmem:[%s445_s4] ss:$0 sm:$0xff]  ;;  %s183_s21 = sshll.u32 %s374_s2, 4  ;;  %s184_s21 = int_to_ptr.vmem [resolvable:$true] %s183_s21 }
  0x19   :  { %126 = vmatpush.bf16.msra.mxu0 %v223_v1 }
  0x1b   :  { %166 = vmatpush.bf16.msra.mxu1 %v225_v4 }
  0x1c   :  { %212 = vmatmul.msk.bf16.vlgmr.msra.gmra.mxu0 %vm115_vm0, %v222_v2 }
  0x99   :  { %v128_v5 = vpop.f32.mrf.mxu0 }
  0x9a   :  { %v129_v7 = vadd.f32 %v236_v6, %v128_v5 }
  0x9c   :  { %v133_v10 = vmax.f32 %v129_v7, 0.0 }
  0xa1   :  { %v130_v8 = vpop.f32.mrf.mxu0 }
  0xa2   :  { %v131_v9 = vadd.f32 %v236_v6, %v130_v8 }
  0xa4   :  { %v134_v11 = vmax.f32 %v131_v9, 0.0 }
  0xa6   :  { %v135_v12 = vpack.c.bf16 %v134_v11, %v133_v10 }
  0xa8   :  { %221 = vmatmul.msk.bf16.vlgmr.msra.gmra.mxu1 %vm115_vm0, %v135_v12 }
 0x125   :  { %v168_v14 = vpop.f32.mrf.mxu1 }
 0x126   :  { %v169_v16 = vadd.f32 %v237_v13, %v168_v14 }
 0x128   :  { %v175_v17 = vmul.f32 %v173_v15, %v169_v16 }
 0x12a   :  { %177 = vst.msk [vmem:[#allocation10] sm:$0xff] %vm115_vm0, %v175_v17 }
 0x12d   :  { %v170_v18 = vpop.f32.mrf.mxu1 }
 0x12e   :  { %v171_v20 = vadd.f32 %v237_v13, %v170_v18 }
 0x130   :  { %v176_v21 = vmul.f32 %v174_v19, %v171_v20 }
 0x132   :  { %178 = vst.msk [vmem:[#allocation10 + $0x8] sm:$0xff] %vm115_vm0, %v176_v21 }
 0x133   :  { %191 = dma.vmem_to_hbm [thread:$0]  %s184_s21, 256, %s186_s24, [#allocation4], %s372_s17, %s372_s17, %s373_s18  }
 0x134   :  { %364 = dma.done.wait [#allocation4], 256  }
 0x135   :  { %365 = vsyncadd [#allocation4], 4294967040 }
 0x136   :  { %196 = vsyncpa [#allocation3], 1 }
 0x137   :  { %197 = vsyncpa [#allocation6], 1 }
 0x138   :  { %198 = vsyncpa [#allocation9], 1 }
 0x139   :  { %199 = vsyncpa [#allocation4], 1 }

</bundles_post_ra>
